<compile_context>
chip_gen: v7x
topology: tpu7x:2x2x1
jax: 0.10.0
libtpu: 0.0.40
codegen_flags: <defaults>
</compile_context>

<pallas_src>
import functools

import jax
import jax.numpy as jnp
from jax.experimental import pallas as pl
from jax.experimental.pallas import tpu as pltpu


def _stable_sigmoid(x):
    # Numerically-stable sigmoid; exp() runs on the EUP slot.
    e = jnp.exp(-jnp.abs(x))
    return jnp.where(x >= 0, 1.0 / (1.0 + e), e / (1.0 + e))


def _prelu(x, a):
    return jnp.where(x >= 0, x, a * x)


# ---------------------------------------------------------------------------
# Kernel 1: global average pool (tiled, f32 accumulation) + squeeze MLP gate.
# Grid (N, HW//TILE); tile axis is a reduction ("arbitrary").
# ---------------------------------------------------------------------------
def _gate_kernel(hw,                      # static: number of spatial positions
                 prelu_ref,               # SMEM (2,): [fc1 slope, conv2 slope]
                 x_ref,                   # (1, TILE, C)
                 w_fc1_ref, b_fc1_ref,    # (C, Cr), (1, Cr)
                 w_fc2_ref, b_fc2_ref,    # (Cr, C), (1, C)
                 att_ref,                 # (1, 1, C) output (written at last tile)
                 sum_ref):                # VMEM scratch (1, C) f32 running sum
    t = pl.program_id(1)

    @pl.when(t == 0)
    def _():
        sum_ref[...] = jnp.zeros_like(sum_ref)

    x = x_ref[0].astype(jnp.float32)                     # (TILE, C), f32 accum
    sum_ref[...] += jnp.sum(x, axis=0, keepdims=True)

    @pl.when(t == pl.num_programs(1) - 1)
    def _():
        a_fc1 = prelu_ref[0]
        m = sum_ref[...] * (1.0 / hw)                    # (1, C) global mean
        # ca_fc1: 1x1 conv C -> C//ratio, PReLU.  (M=1 matmul, tiny -> f32.)
        h = jnp.dot(m, w_fc1_ref[...], preferred_element_type=jnp.float32)
        h = _prelu(h + b_fc1_ref[...], a_fc1)            # (1, Cr)
        # ca_fc2: 1x1 conv C//ratio -> C, sigmoid -> channel attention weights.
        g = jnp.dot(h, w_fc2_ref[...], preferred_element_type=jnp.float32)
        att_ref[0] = _stable_sigmoid(g + b_fc2_ref[...])  # (1, C)


# ---------------------------------------------------------------------------
# Kernel 2: gated 1x1 conv + PReLU, gate folded into the (C, C) weight.
# Grid (N, HW//TILE); both axes independent ("parallel").
# ---------------------------------------------------------------------------
def _gated_conv_kernel(prelu_ref,            # SMEM (2,)
                       att_ref,              # (1, C, 1) gate column for image n
                       x_ref,                # (1, TILE, C)
                       w_c2_ref, b_c2_ref,   # (C, C), (1, C)
                       out_ref):             # (1, TILE, C)
    a_c2 = prelu_ref[1]
    # Fold the per-channel gate into the weight rows: w[c, d] * att[c].
    # Only a CxC VPU multiply per step (vs. TILExC when gating the activations).
    w = (w_c2_ref[...] * att_ref[0]).astype(jnp.bfloat16)        # (C, C)
    x = x_ref[0].astype(jnp.bfloat16)                            # (TILE, C)
    z = jnp.dot(x, w, preferred_element_type=jnp.float32) + b_c2_ref[...]
    out_ref[0] = _prelu(z, a_c2).astype(out_ref.dtype)


def _pick_tile_rows(hw, target=512):
    """Largest multiple of 8 that divides hw and is <= target (else hw)."""
    if hw <= target:
        return hw
    cand = (target // 8) * 8
    while cand >= 8:
        if hw % cand == 0:
            return cand
        cand -= 8
    return hw


def ca_forward(x, params, *, row_tile_target=512):
    """x: (N, H, W, C) NHWC.  Returns (N, H, W, C) in x.dtype."""
    N, H, W, C = x.shape
    HW = H * W
    Cr = params["w_fc1"].shape[1]
    tile = _pick_tile_rows(HW, row_tile_target)
    T = HW // tile
    x2 = x.reshape(N, HW, C)                 # row-major (free); lane-dense C

    smem_spec = pl.BlockSpec(memory_space=pltpu.MemorySpace.SMEM)
    x_spec = pl.BlockSpec((1, tile, C), lambda n, t: (n, t, 0))

    # Explicit scoped-VMEM budget: double-buffered in+out tiles + params + slack.
    act_tile_bytes = tile * C * x.dtype.itemsize
    param_bytes = sum(int(v.size) * v.dtype.itemsize for v in params.values())
    need = 4 * act_tile_bytes + 2 * param_bytes + (4 << 20)
    vmem_limit = int(max(need, 32 << 20))

    # --- Kernel 1: per-image channel-attention gate, shape (N, 1, C) ---------
    att = pl.pallas_call(
        functools.partial(_gate_kernel, float(HW)),
        out_shape=jax.ShapeDtypeStruct((N, 1, C), jnp.float32),
        grid=(N, T),
        in_specs=[
            smem_spec,                                      # PReLU slopes
            x_spec,                                         # x tile
            pl.BlockSpec((C, Cr), lambda n, t: (0, 0)),     # fc1 weight
            pl.BlockSpec((1, Cr), lambda n, t: (0, 0)),     # fc1 bias
            pl.BlockSpec((Cr, C), lambda n, t: (0, 0)),     # fc2 weight
            pl.BlockSpec((1, C), lambda n, t: (0, 0)),      # fc2 bias
        ],
        out_specs=pl.BlockSpec((1, 1, C), lambda n, t: (n, 0, 0)),
        scratch_shapes=[pltpu.VMEM((1, C), jnp.float32)],
        compiler_params=pltpu.CompilerParams(
            dimension_semantics=("parallel", "arbitrary"),
            vmem_limit_bytes=vmem_limit),
    )(params["prelu"], x2,
      params["w_fc1"], params["b_fc1"],
      params["w_fc2"], params["b_fc2"])

    # Reshape the tiny gate to a column (N, C, 1) in XLA so the conv kernel can
    # broadcast it against the (C, C) weight with no in-kernel relayout.
    att_col = att.reshape(N, C, 1)

    # --- Kernel 2: gated 1x1 conv + PReLU ------------------------------------
    out = pl.pallas_call(
        _gated_conv_kernel,
        out_shape=jax.ShapeDtypeStruct((N, HW, C), x.dtype),
        grid=(N, T),
        in_specs=[
            smem_spec,                                      # PReLU slopes
            pl.BlockSpec((1, C, 1), lambda n, t: (n, 0, 0)),  # gate column
            x_spec,                                         # x tile
            pl.BlockSpec((C, C), lambda n, t: (0, 0)),      # conv2 weight
            pl.BlockSpec((1, C), lambda n, t: (0, 0)),      # conv2 bias
        ],
        out_specs=x_spec,
        compiler_params=pltpu.CompilerParams(
            dimension_semantics=("parallel", "parallel"),
            vmem_limit_bytes=vmem_limit),
    )(params["prelu"], att_col, x2,
      params["w_c2"], params["b_c2"])

    return out.reshape(N, H, W, C)


# ---------------- pure-JAX reference (mirrors the PyTorch forward) -----------

def ca_reference(x, params):
    a_fc1 = params["prelu"][0]
    a_c2 = params["prelu"][1]
    m = jnp.mean(x, axis=(1, 2), keepdims=True)                       # (N,1,1,C)
    h = (jnp.einsum("nhwc,cr->nhwr", m, params["w_fc1"])
         + params["b_fc1"].reshape(1, 1, 1, -1))
    h = jnp.where(h >= 0, h, a_fc1 * h)
    att = jax.nn.sigmoid(
        jnp.einsum("nhwr,rc->nhwc", h, params["w_fc2"])
        + params["b_fc2"].reshape(1, 1, 1, -1))                       # (N,1,1,C)
    z = (jnp.einsum("nhwc,cd->nhwd", x * att, params["w_c2"])
         + params["b_c2"].reshape(1, 1, 1, -1))
    return jnp.where(z >= 0, z, a_c2 * z)


# ---------------------------------- main -------------------------------------

def make_params(key, nfeat, ratio):
    cr = nfeat // ratio
    ks = jax.random.split(key, 6)
    return {
        "w_fc1": jax.random.normal(ks[0], (nfeat, cr), jnp.float32) * 0.1,
        "b_fc1": jax.random.normal(ks[1], (1, cr), jnp.float32) * 0.1,
        "w_fc2": jax.random.normal(ks[2], (cr, nfeat), jnp.float32) * 0.1,
        "b_fc2": jax.random.normal(ks[3], (1, nfeat), jnp.float32) * 0.1,
        "w_c2": jax.random.normal(ks[4], (nfeat, nfeat), jnp.float32) * 0.1,
        "b_c2": jax.random.normal(ks[5], (1, nfeat), jnp.float32) * 0.1,
        # nn.PReLU() default: one slope per module, init 0.25 ([fc1, conv2]).
        "prelu": jnp.full((2,), 0.25, jnp.float32),
    }


if __name__ == "__main__":
    # Small but tiling-exercising shapes: HW = 1024 -> 2 row tiles of 512.
    nfeat, ratio, N, H, W = 128, 8, 2, 32, 32
    key = jax.random.PRNGKey(0)
    k_x, k_p = jax.random.split(key, 2)
    x = jax.random.normal(k_x, (N, H, W, nfeat), jnp.float32)
    params = make_params(k_p, nfeat, ratio)

    out = jax.block_until_ready(ca_forward(x, params))
    ref = jax.block_until_ready(ca_reference(x, params))

    assert out.shape == (N, H, W, nfeat)
    # The gated conv uses bf16 MXU inputs (f32 accumulation), so compare to the
    # f32 reference with a bf16-appropriate tolerance.
    max_err = float(jnp.max(jnp.abs(out - ref)))
    assert jnp.allclose(out, ref, rtol=5e-2, atol=5e-2), max_err
    print("KERNEL_OK")
</pallas_src>

<mosaic_0001>
module attributes {stable_mosaic.version = 11 : i64} {
  func.func @_gate_kernel(%arg0: i32, %arg1: i32, %arg2: memref<2xf32, #tpu.memory_space<smem>>, %arg3: memref<1x512x128xf32, #tpu.memory_space<vmem>>, %arg4: memref<128x16xf32, #tpu.memory_space<vmem>>, %arg5: memref<1x16xf32, #tpu.memory_space<vmem>>, %arg6: memref<16x128xf32, #tpu.memory_space<vmem>>, %arg7: memref<1x128xf32, #tpu.memory_space<vmem>>, %arg8: memref<1x1x128xf32, #tpu.memory_space<vmem>>, %arg9: memref<1x128xf32, #tpu.memory_space<vmem>>) attributes {dimension_semantics = [#tpu.dimension_semantics<parallel>, #tpu.dimension_semantics<arbitrary>], iteration_bounds = array<i64: 2, 2>, scalar_prefetch = 0 : i64, scratch_operands = 1 : i64, tpu.core_type = #tpu.core_type<tc>, window_params = [{transform_indices = @transform_0, window_bounds = array<i64: 2>}, {transform_indices = @transform_1, window_bounds = array<i64: 1, 512, 128>}, {pipeline_mode = #tpu.pipeline_mode<synchronous>, transform_indices = @transform_2, window_bounds = array<i64: 128, 16>}, {pipeline_mode = #tpu.pipeline_mode<synchronous>, transform_indices = @transform_3, window_bounds = array<i64: 1, 16>}, {pipeline_mode = #tpu.pipeline_mode<synchronous>, transform_indices = @transform_4, window_bounds = array<i64: 16, 128>}, {pipeline_mode = #tpu.pipeline_mode<synchronous>, transform_indices = @transform_5, window_bounds = array<i64: 1, 128>}, {transform_indices = @transform_6, window_bounds = array<i64: 1, 1, 128>}]} {
    %c0_i32 = arith.constant 0 : i32
    %0 = arith.cmpi eq, %arg1, %c0_i32 : i32
    %1 = arith.extui %0 : i1 to i32
    %c0_i32_0 = arith.constant 0 : i32
    %2 = arith.cmpi ne, %1, %c0_i32_0 : i32
    scf.if %2 {
      %cst_8 = arith.constant 0.000000e+00 : f32
      %13 = vector.broadcast %cst_8 : f32 to vector<1x128xf32>
      %c0_9 = arith.constant 0 : index
      %c0_10 = arith.constant 0 : index
      %14 = vector.load %arg9[%c0_9, %c0_10] : memref<1x128xf32, #tpu.memory_space<vmem>>, vector<1x128xf32>
      tpu.vector_store %arg9[%c0_9, %c0_10], %13 {strides = array<i32>} : memref<1x128xf32, #tpu.memory_space<vmem>>, vector<1x128xf32>,
    } else {
    }
    %c0 = arith.constant 0 : index
    %c0_1 = arith.constant 0 : index
    %c0_2 = arith.constant 0 : index
    %3 = vector.load %arg3[%c0, %c0_1, %c0_2] : memref<1x512x128xf32, #tpu.memory_space<vmem>>, vector<1x512x128xf32>
    %4 = vector.shape_cast %3 : vector<1x512x128xf32> to vector<512x128xf32>
    %c0_3 = arith.constant 0 : index
    %c0_4 = arith.constant 0 : index
    %5 = vector.load %arg9[%c0_3, %c0_4] : memref<1x128xf32, #tpu.memory_space<vmem>>, vector<1x128xf32>
    %cst = arith.constant dense<0.000000e+00> : vector<128xf32>
    %6 = vector.multi_reduction <add>, %4, %cst [0] : vector<512x128xf32> to vector<128xf32>
    %7 = vector.shape_cast %6 : vector<128xf32> to vector<1x128xf32>
    %8 = arith.addf %5, %7 : vector<1x128xf32>
    %c0_5 = arith.constant 0 : index
    %c0_6 = arith.constant 0 : index
    %9 = vector.load %arg9[%c0_5, %c0_6] : memref<1x128xf32, #tpu.memory_space<vmem>>, vector<1x128xf32>
    tpu.vector_store %arg9[%c0_5, %c0_6], %8 {strides = array<i32>} : memref<1x128xf32, #tpu.memory_space<vmem>>, vector<1x128xf32>,
    %c1_i32 = arith.constant 1 : i32
    %10 = arith.cmpi eq, %arg1, %c1_i32 : i32
    %11 = arith.extui %10 : i1 to i32
    %c0_i32_7 = arith.constant 0 : i32
    %12 = arith.cmpi ne, %11, %c0_i32_7 : i32
    scf.if %12 {
      %c0_8 = arith.constant 0 : index
      %13 = memref.load %arg2[%c0_8] : memref<2xf32, #tpu.memory_space<smem>>
      %c0_9 = arith.constant 0 : index
      %c0_10 = arith.constant 0 : index
      %14 = vector.load %arg9[%c0_9, %c0_10] : memref<1x128xf32, #tpu.memory_space<vmem>>, vector<1x128xf32>
      %cst_11 = arith.constant 9.765625E-4 : f32
      %15 = vector.broadcast %cst_11 : f32 to vector<1x128xf32>
      %16 = arith.mulf %14, %15 : vector<1x128xf32>
      %c0_12 = arith.constant 0 : index
      %c0_13 = arith.constant 0 : index
      %17 = vector.load %arg4[%c0_12, %c0_13] : memref<128x16xf32, #tpu.memory_space<vmem>>, vector<128x16xf32>
      %cst_14 = arith.constant dense<0.000000e+00> : vector<1x16xf32>
      %18 = tpu.matmul %16, %17, %cst_14 {dimension_numbers = #tpu.dot_dimension_numbers<[1], [0], [0], [1], [0, 0, 1, 1], [], []>} : vector<1x128xf32>, vector<128x16xf32>, vector<1x16xf32> -> vector<1x16xf32>
      %c0_15 = arith.constant 0 : index
      %c0_16 = arith.constant 0 : index
      %19 = vector.load %arg5[%c0_15, %c0_16] : memref<1x16xf32, #tpu.memory_space<vmem>>, vector<1x16xf32>
      %20 = arith.addf %18, %19 : vector<1x16xf32>
      %cst_17 = arith.constant 0.000000e+00 : f32
      %21 = vector.broadcast %cst_17 : f32 to vector<1x16xf32>
      %22 = arith.cmpf oge, %20, %21 : vector<1x16xf32>
      %23 = vector.broadcast %13 : f32 to vector<1x16xf32>
      %24 = arith.mulf %23, %20 : vector<1x16xf32>
      %25 = arith.select %22, %20, %24 : vector<1x16xi1>, vector<1x16xf32>
      %c0_18 = arith.constant 0 : index
      %c0_19 = arith.constant 0 : index
      %26 = vector.load %arg6[%c0_18, %c0_19] : memref<16x128xf32, #tpu.memory_space<vmem>>, vector<16x128xf32>
      %cst_20 = arith.constant dense<0.000000e+00> : vector<1x128xf32>
      %27 = tpu.matmul %25, %26, %cst_20 {dimension_numbers = #tpu.dot_dimension_numbers<[1], [0], [0], [1], [0, 0, 1, 1], [], []>} : vector<1x16xf32>, vector<16x128xf32>, vector<1x128xf32> -> vector<1x128xf32>
      %c0_21 = arith.constant 0 : index
      %c0_22 = arith.constant 0 : index
      %28 = vector.load %arg7[%c0_21, %c0_22] : memref<1x128xf32, #tpu.memory_space<vmem>>, vector<1x128xf32>
      %29 = arith.addf %27, %28 : vector<1x128xf32>
      %30 = math.absf %29 : vector<1x128xf32>
      %cst_23 = arith.constant 0.000000e+00 : f32
      %31 = vector.broadcast %cst_23 : f32 to vector<1x128xf32>
      %32 = arith.subf %31, %30 : vector<1x128xf32>
      %33 = math.exp %32 : vector<1x128xf32>
      %cst_24 = arith.constant 0.000000e+00 : f32
      %34 = vector.broadcast %cst_24 : f32 to vector<1x128xf32>
      %35 = arith.cmpf oge, %29, %34 : vector<1x128xf32>
      %cst_25 = arith.constant 1.000000e+00 : f32
      %36 = vector.broadcast %cst_25 : f32 to vector<1x128xf32>
      %37 = arith.addf %36, %33 : vector<1x128xf32>
      %cst_26 = arith.constant 1.000000e+00 : f32
      %38 = vector.broadcast %cst_26 : f32 to vector<1x128xf32>
      %39 = arith.divf %38, %37 : vector<1x128xf32>
      %cst_27 = arith.constant 1.000000e+00 : f32
      %40 = vector.broadcast %cst_27 : f32 to vector<1x128xf32>
      %41 = arith.addf %40, %33 : vector<1x128xf32>
      %42 = arith.divf %33, %41 : vector<1x128xf32>
      %43 = arith.select %35, %39, %42 : vector<1x128xi1>, vector<1x128xf32>
      %c0_28 = arith.constant 0 : index
      %c0_29 = arith.constant 0 : index
      %c0_30 = arith.constant 0 : index
      %44 = vector.load %arg8[%c0_28, %c0_29, %c0_30] : memref<1x1x128xf32, #tpu.memory_space<vmem>>, vector<1x1x128xf32>
      %45 = vector.shape_cast %44 : vector<1x1x128xf32> to vector<1x128xf32>
      %46 = vector.shape_cast %43 : vector<1x128xf32> to vector<1x1x128xf32>
      tpu.vector_store %arg8[%c0_28, %c0_29, %c0_30], %46 {strides = array<i32>} : memref<1x1x128xf32, #tpu.memory_space<vmem>>, vector<1x1x128xf32>,
    } else {
    }
    return
  }
  func.func @transform_0(%arg0: i32, %arg1: i32) -> i32 {
    %c0_i32 = arith.constant 0 : i32
    %c0_i32_0 = arith.constant 0 : i32
    return %c0_i32 : i32
  }
  func.func @transform_1(%arg0: i32, %arg1: i32) -> (i32, i32, i32) {
    %c0_i32 = arith.constant 0 : i32
    %c0_i32_0 = arith.constant 0 : i32
    return %arg0, %arg1, %c0_i32 : i32, i32, i32
  }
  func.func @transform_2(%arg0: i32, %arg1: i32) -> (i32, i32) {
    %c0_i32 = arith.constant 0 : i32
    %c0_i32_0 = arith.constant 0 : i32
    %c0_i32_1 = arith.constant 0 : i32
    return %c0_i32, %c0_i32_0 : i32, i32
  }
  func.func @transform_3(%arg0: i32, %arg1: i32) -> (i32, i32) {
    %c0_i32 = arith.constant 0 : i32
    %c0_i32_0 = arith.constant 0 : i32
    %c0_i32_1 = arith.constant 0 : i32
    return %c0_i32, %c0_i32_0 : i32, i32
  }
  func.func @transform_4(%arg0: i32, %arg1: i32) -> (i32, i32) {
    %c0_i32 = arith.constant 0 : i32
    %c0_i32_0 = arith.constant 0 : i32
    %c0_i32_1 = arith.constant 0 : i32
    return %c0_i32, %c0_i32_0 : i32, i32
  }
  func.func @transform_5(%arg0: i32, %arg1: i32) -> (i32, i32) {
    %c0_i32 = arith.constant 0 : i32
    %c0_i32_0 = arith.constant 0 : i32
    %c0_i32_1 = arith.constant 0 : i32
    return %c0_i32, %c0_i32_0 : i32, i32
  }
  func.func @transform_6(%arg0: i32, %arg1: i32) -> (i32, i32, i32) {
    %c0_i32 = arith.constant 0 : i32
    %c0_i32_0 = arith.constant 0 : i32
    %c0_i32_1 = arith.constant 0 : i32
    return %arg0, %c0_i32, %c0_i32_0 : i32, i32, i32
  }
}

</mosaic_0001>

<bundles_post_ra>
// kernel: tpu_custom_call.1
= control target key start
LH: loop header
LB: loop body
LE: loop exit
PB: predicated region body
PF: predicated region fallthrough
CT: control target
= control target key end

     0   :  { %s1553_s0 = inlined_call_operand.vmem [shape: f32[2], index: 0, kind: input, shape index: {}]   ;;  %s1554_s1 = inlined_call_operand.hbm [shape: f32[2,1024,128], index: 1, kind: input, shape index: {}]   ;;  %s1555_s2 = inlined_call_operand.vmem [shape: f32[128,16], index: 2, kind: input, shape index: {}]   ;;  %s1556_s3 = inlined_call_operand.vmem [shape: f32[1,16], index: 3, kind: input, shape index: {}]   ;;  %s1557_s4 = inlined_call_operand.vmem [shape: f32[16,128], index: 4, kind: input, shape index: {}]   ;;  %s1558_s5 = inlined_call_operand.vmem [shape: f32[1,128], index: 5, kind: input, shape index: {}]   ;;  %s1559_s6 = inlined_call_operand.hbm [shape: f32[2,1,128], index: 6, kind: output, shape index: {}]  }
   0x1   :  { %1573 = sst [smem:[#allocation19_spill]] %s1553_s0 }
   0x2   :  { %1574 = sst [smem:[#allocation20_spill]] %s1559_s6 }
   0x3   :  { %11 = vsyncpa [#allocation6], 0 }
   0x4   :  { %12 = vsyncpa [#allocation4], 0 }
   0x5   :  { %14 = vsyncpa [#allocation4 + $0x1], 0 }
   0x6   :  { %15 = vsyncpa [#allocation5], 0 }
   0x7   :  { %17 = vsyncpa [#allocation5 + $0x1], 0  ;;  %s1179_s21 = smov 0   ;;  %s1181_s22 = smov 0  }
   0x8   :  { %s1183_s23 = smov 0   ;;  %s1185_s24 = smov 0  }
   0x9   :  { %s1187_s25 = smov 0   ;;  %s1189_s26 = smov 0  }
   0xa   :  { %s1191_s27 = smov 0   ;;  %s1193_s28 = smov 0  }
   0xb   :  { %s1195_s29 = smov 0   ;;  %s1197_s30 = smov 0  }
   0xc   :  { %s1199_s7 = smov 0  }
   0xd LB: > { %1575 = sst [smem:[#allocation12_spill]] %s1093_s21  ;;  %s732_s8 = sadd.s32 4294967295, %s1133_s7   ;;  %s1133_s7 = sphi %s1199_s7, %s23_s7   ;;  %s1129_s30 = sphi %s1197_s30, %s1612_s30   ;;  %s1125_s29 = sphi %s1195_s29, %s1603_s29   ;;  %s1121_s28 = sphi %s1193_s28, %s1611_s28   ;;  %s1117_s27 = sphi %s1191_s27, %s1602_s27   ;;  %s1113_s26 = sphi %s1189_s26, %s1610_s26   ;;  %s1109_s25 = sphi %s1187_s25, %s1609_s25   ;;  %s1105_s24 = sphi %s1185_s24, %s1608_s24   ;;  %s1101_s23 = sphi %s1183_s23, %s1607_s23   ;;  %s1097_s22 = sphi %s1181_s22, %s1606_s22   ;;  %s1093_s21 = sphi %s1179_s21, %s1605_s21  }
   0xe   : > { %1576 = sst [smem:[#allocation13_spill]] %s1125_s29  ;;  %s733_s9 = sadd.s32 4294967294, %s1133_s7  }
   0xf   : > { %1577 = sst [smem:[#allocation14_spill]] %s1133_s7  ;;  %p72_p0 = scmp.ne.s32.totalorder %s1113_s26, %s1109_s25 }
  0x10   : > { %p73_p1 = scmp.eq.s32.totalorder %s1133_s7, 0  ;;  %p78_p2 = scmp.ne.s32.totalorder %s1109_s25, %s1105_s24 }
  0x11   : > { %p1239_p3 = scmp.eq.s32.totalorder %s732_s8, 0  ;;  %p185_p5 = scmp.ne.s32.totalorder %s1101_s23, %s1097_s22 }
  0x12   : > { %p1244_p4 = por %p73_p1, %p72_p0  ;;  %p186_p7 = scmp.eq.s32.totalorder %s732_s8, 3 }
  0x13   : > { %p1252_p6 = por %p1239_p3, %p78_p2  ;;  %p191_p8 = scmp.ne.s32.totalorder %s1097_s22, %s1093_s21 }
  0x14   : > { %p192_p9 = scmp.eq.s32.totalorder %s733_s9, 3  ;;  %p1258_p10 = por %p186_p7, %p185_p5 }
  0x15   : > { %s1580_s14 = scalar_select %p1252_p6, 1, 0 }
  0x16   : > { %s1581_s15 = scalar_select %p1258_p10, 1, 0 }
  0x17   : > { %p734_p11 = scmp.ge.s32.totalorder %s1133_s7, 1  ;;  %p1263_p12 = por %p192_p9, %p191_p8 }
  0x18   : > { %1582 = sst [smem:[#allocation15_spill]] %s1581_s15  ;;  %p199_p13 = scmp.lt.s32.totalorder %s1133_s7, 5 }
  0x19   : > { %s1583_s16 = scalar_select %p1263_p12, 1, 0 }
  0x1a   : > { %s1585_s0 = sld [smem:[#allocation19_spill]]  ;;  %p1271_p0 = pnand %p734_p11, %p199_p13 }
  0x1b   : > { %1584 = sst [smem:[#allocation16_spill]] %s1583_s16  ;;  %p860_p2 = scmp.lt.s32.totalorder %s1133_s7, 4 }
  0x1c   : > { %s1586_s20 = scalar_select %p1271_p0, 1, 0 }
  0x1d   : > { %p847_p1 = pneg %p1271_p0  ;;  %p1282_p7 = pnand %p860_p2, %p1244_p4 }
  0x1f   : > { %p848_p5 = pnand %p847_p1, %p1239_p3 }
  0x20   : > { %s212_s19 = sshll.u32 %s1585_s0, 4  ;;  %s213_s19 = int_to_ptr.vmem [resolvable:$true] %s212_s19 }
  0x21   : > { %s962_s8 = scalar_lea.vmem %s213_s19, 16  ;;  %p964_p9 = pneg %p848_p5 }
  0x22   : > { %p963_p8 = scmp.ne.s32.totalorder %s213_s19, %s962_s8  ;;  %p970_p13 = scmp.lt.s32.totalorder %s213_s19, %s213_s19 }
  0x23   : > { %p971_p10 = scmp.lt.s32.totalorder %s962_s8, %s962_s8 }
  0x24   : > { %p965_p12 = pnand %p964_p9, %p963_p8 }
  0x25   : > { %p972_p6 = por %p971_p10, %p970_p13 }
  0x26   : > { %p966_p11 = pneg %p965_p12 }
  0x28   : > { %p973_p0 = pnand %p972_p6, %p966_p11 }
  0x2a   : > { %976 = shalt.err (!%p973_p0)
}
  0x2b   : > { %s1135_s9 = smov [#allocation3]   ;;  %s32_s13 = sadd.s32 1, %s1125_s29 }
  0x2c   : > { %850 = dma.vmem_to_smem (!%p848_p5), %s213_s19, 16, %s1135_s9, [#allocation6]  }
  0x2d   : > { %s35_s17 = sadd.s32 1, %s1129_s30  ;;  %p33_p4 = scmp.ge.s32.totalorder %s32_s13, 2 }
  0x2e   : > { %s235_s18 = sand.u32 1, %s1113_s26   ;;  %s738_s12 = sshll.u32 %s1125_s29, 6 }
  0x2f   : > { %s737_s10 = sshll.u32 %s235_s18, 9  ;;  %s1614_s13 = smov (%p33_p4, %s32_s13), 0 }
  0x30   : > { %1588 = sst [smem:[#allocation17_spill]] %s1614_s13  ;;  %s1616_s17 = smov (!%p33_p4, %s35_s17), %s1129_s30 }
  0x31   : > { %s61_s8 = ssub.s32 %s1125_s29, %s1614_s13  ;;  %p37_p6 = scmp.ge.s32.totalorder %s1616_s17, 2 }
  0x32   : > { %s739_s0 = sshll.u32 %s1129_s30, 7  ;;  %s239_s16 = scalar_lea.vmem [#allocation7], %s737_s10 }
  0x33   : > { %s248_s19 = sshll.u32 %s239_s16, 4  ;;  %s1618_s17 = smov (%p37_p6, %s1616_s17), 0  ;;  %s1298_s19 = int_to_ptr.vmem [resolvable:$true] %s248_s19 }
  0x34   : > { %1589 = sst [smem:[#allocation18_spill]] %s1618_s17  ;;  %s245_s9 = sadd.s32 %s739_s0, %s738_s12 }
  0x35   : > { %s60_s21 = ssub.s32 %s1129_s30, %s1618_s17  ;;  %s740_s7 = sshll.u32 %s245_s9, 7 }
  0x36   : > { %s62_s6 = sor.u32 %s61_s8, %s60_s21  ;;  %p173_p10 = scmp.eq.s32.totalorder %s60_s21, 0 }
  0x37   : > { %p63_p12 = scmp.eq.s32.totalorder %s62_s6, 0  ;;  %s1305_s29 = scalar_lea.hbm %s1554_s1, %s740_s7 }
  0x38   : > { %s1590_s10 = sadd.s32 1, %s1101_s23  ;;  %s1591_s0 = sadd.s32 1, %s1113_s26 }
  0x39   : > { %s1310_s16 = scalar_select %p173_p10, %s1101_s23, %s1590_s10  }
  0x3a   : > { %s1315_s12 = scalar_select %p63_p12, %s1113_s26, %s1591_s0  }
  0x3b   : > { %s1317_s17 = scalar_lea.sflag [#allocation4], %s235_s18  ;;  %s977_s8 = scalar_lea.hbm %s1305_s29, 8192 }
  0x3c   : > { %p978_p0 = scmp.ne.s32.totalorder %s1305_s29, %s977_s8  ;;  %p979_p1 = pneg %p1282_p7 }
  0x3d   : > { %s982_s7 = scalar_lea.hbm %s1554_s1, 32768  ;;  %p983_p8 = scmp.lt.u32.totalorder %s1305_s29, %s1554_s1 }
  0x3e   : > { %p980_p2 = pnand %p979_p1, %p978_p0  ;;  %p984_p9 = scmp.lt.u32.totalorder %s982_s7, %s977_s8 }
  0x3f   : > { %p986_p13 = scmp.lt.u32.totalorder %s977_s8, %s1305_s29 }
  0x40   : > { %p981_p5 = pneg %p980_p2  ;;  %p985_p11 = por %p984_p9, %p983_p8 }
  0x42   : > { %p987_p4 = por %p986_p13, %p985_p11 }
  0x44   : > { %p988_p6 = pnand %p987_p4, %p981_p5 }
  0x46   : > { %991 = shalt.err (!%p988_p6)
}
  0x47   : > { %s992_s18 = scalar_lea.vmem %s1298_s19, 8192  ;;  %s1136_s9 = smov [#allocation7]  }
  0x48   : > { %p993_p10 = scmp.ne.s32.totalorder %s1298_s19, %s992_s18  ;;  %s997_s10 = sshll.u32 %s1136_s9, 4  ;;  %s998_s10 = int_to_ptr.vmem [resolvable:$false] %s997_s10 }
  0x49   : > { %s999_s0 = scalar_lea.vmem %s998_s10, 16384  ;;  %p1000_p2 = scmp.lt.s32.totalorder %s1298_s19, %s998_s10 }
  0x4a   : > { %p995_p12 = pnand %p993_p10, %p979_p1  ;;  %p1001_p8 = scmp.lt.s32.totalorder %s999_s0, %s992_s18 }
  0x4c   : > { %p996_p0 = pneg %p995_p12  ;;  %p1002_p9 = por %p1001_p8, %p1000_p2 }
  0x4e   : > { %p1003_p11 = pnand %p1002_p9, %p996_p0 }
  0x50   : > { %1006 = shalt.err (!%p1003_p11)
}
  0x51   : > { %s1137_s8 = smov 128   ;;  %s1138_s6 = smov 8  }
  0x52   : > { %854 = dma.hbm_to_vmem [thread:$0]  (!%p1282_p7), %s1305_s29, 8192, %s1298_s19, %s1317_s17, %s1137_s8, %s1137_s8, %s1138_s6  }
  0x53   : > { %p1592_p1 = scmp.ne.s32.totalorder %s1586_s20, 0 }
  0x55   : > { %260 = sbr.rel (%p1592_p1) target bundleno = 751 (0x2ef), region = 44 }
  0x5c   : > { %1080 = dma.done.wait (%p1239_p3), [#allocation6], 16  }
  0x5d   : > { %1082 = vsyncadd (%p1239_p3), [#allocation6], 4294967280  ;;  %s266_s21 = sand.u32 1, %s1109_s25   ;;  %p1593_p5 = scmp.ne.s32.totalorder %s1580_s14, 0 }
  0x5e   : > { %s743_s7 = sshll.u32 %s266_s21, 9  ;;  %s267_s15 = scalar_lea.sflag [#allocation4], %s266_s21 }
  0x5f   : > { %s1352_s13 = scalar_lea.vmem [#allocation7], %s743_s7 }
  0x60   : > { %1084 = dma.done.wait (%p1593_p5), %s267_s15, 8192  }
  0x61   : > { %1086 = vsyncadd (%p1593_p5), %s267_s15, 4294959104 }
  0x62   : > { %275 = sfence }
  0x63   : > { %s297_s29 = sand.u32 1, %s1097_s22   ;;  %p744_p3 = scmp.ne.s32.totalorder %s1117_s27, 0 }
  0x64   : > { %s1361_s20 = scalar_lea.vmem [#allocation8], %s297_s29  ;;  %v1139_v0 = vmov (!%p744_p3), 0.0  }
  0x65   : > { %303 = sbr.rel (%p744_p3) target bundleno = 108 (0x6c), region = 56  ;;  %304 = vst [vmem:[#allocation2] sm:$0x1] (!%p744_p3), %v1139_v0 }
  0x6c PF: > { %v305_v1 = vld [vmem:[%s1352_s13] sm:$0xff]  ;;  %v306_v2 = vld [vmem:[%s1352_s13 + $0x8] sm:$0xff]  ;;  %v307_v3 = vld [vmem:[%s1352_s13 + $0x10] sm:$0xff]  ;;  %p745_p7 = scmp.ne.s32.totalorder %s1117_s27, 1 }
  0x6d   : > { %v370_v4 = vadd.f32 %v306_v2, %v305_v1  ;;  %v308_v5 = vld [vmem:[%s1352_s13 + $0x18] sm:$0xff]  ;;  %v309_v7 = vld [vmem:[%s1352_s13 + $0x20] sm:$0xff]  ;;  %v310_v9 = vld [vmem:[%s1352_s13 + $0x28] sm:$0xff]  ;;  %vm1141_vm0 = vmmov (!%p745_p7), 0   ;;  %s445_s19 = sld [smem:[#allocation3]] (!%p745_p7)  ;;  %vm542_vm2 = vcmask (!%p745_p7), 130048  }
  0x6e   : > { %v311_v11 = vld [vmem:[%s1352_s13 + $0x30] sm:$0xff]  ;;  %v312_v13 = vld [vmem:[%s1352_s13 + $0x38] sm:$0xff]  ;;  %v313_v15 = vld [vmem:[%s1352_s13 + $0x40] sm:$0xff] }
  0x6f   : > { %v371_v6 = vadd.f32 %v370_v4, %v307_v3  ;;  %v314_v17 = vld [vmem:[%s1352_s13 + $0x48] sm:$0xff]  ;;  %v315_v19 = vld [vmem:[%s1352_s13 + $0x50] sm:$0xff]  ;;  %v316_v21 = vld [vmem:[%s1352_s13 + $0x58] sm:$0xff] }
  0x70   : > { %v317_v23 = vld [vmem:[%s1352_s13 + $0x60] sm:$0xff]  ;;  %v318_v25 = vld [vmem:[%s1352_s13 + $0x68] sm:$0xff]  ;;  %v319_v27 = vld [vmem:[%s1352_s13 + $0x70] sm:$0xff] }
  0x71   : > { %v372_v8 = vadd.f32 %v371_v6, %v308_v5  ;;  %v320_v29 = vld [vmem:[%s1352_s13 + $0x78] sm:$0xff]  ;;  %v321_v31 = vld [vmem:[%s1352_s13 + $0x80] sm:$0xff]  ;;  %v322_v33 = vld [vmem:[%s1352_s13 + $0x88] sm:$0xff] }
  0x72   : > { %v323_v35 = vld [vmem:[%s1352_s13 + $0x90] sm:$0xff]  ;;  %v324_v37 = vld [vmem:[%s1352_s13 + $0x98] sm:$0xff]  ;;  %v325_v39 = vld [vmem:[%s1352_s13 + $0xa0] sm:$0xff] }
  0x73   : > { %v373_v10 = vadd.f32 %v372_v8, %v309_v7  ;;  %v326_v41 = vld [vmem:[%s1352_s13 + $0xa8] sm:$0xff]  ;;  %v327_v43 = vld [vmem:[%s1352_s13 + $0xb0] sm:$0xff]  ;;  %v328_v45 = vld [vmem:[%s1352_s13 + $0xb8] sm:$0xff] }
  0x74   : > { %v329_v47 = vld [vmem:[%s1352_s13 + $0xc0] sm:$0xff]  ;;  %v330_v49 = vld [vmem:[%s1352_s13 + $0xc8] sm:$0xff]  ;;  %v331_v51 = vld [vmem:[%s1352_s13 + $0xd0] sm:$0xff] }
  0x75   : > { %v374_v12 = vadd.f32 %v373_v10, %v310_v9  ;;  %v332_v53 = vld [vmem:[%s1352_s13 + $0xd8] sm:$0xff]  ;;  %v333_v55 = vld [vmem:[%s1352_s13 + $0xe0] sm:$0xff]  ;;  %v334_v57 = vld [vmem:[%s1352_s13 + $0xe8] sm:$0xff] }
  0x76   : > { %v335_v59 = vld [vmem:[%s1352_s13 + $0xf0] sm:$0xff]  ;;  %v336_v61 = vld [vmem:[%s1352_s13 + $0xf8] sm:$0xff]  ;;  %v337_v63 = vld [vmem:[%s1352_s13 + $0x100] sm:$0xff] }
  0x77   : > { %v375_v14 = vadd.f32 %v374_v12, %v311_v11  ;;  %v338_v1 = vld [vmem:[%s1352_s13 + $0x108] sm:$0xff]  ;;  %v339_v3 = vld [vmem:[%s1352_s13 + $0x110] sm:$0xff]  ;;  %v340_v5 = vld [vmem:[%s1352_s13 + $0x118] sm:$0xff] }
  0x78   : > { %v341_v7 = vld [vmem:[%s1352_s13 + $0x120] sm:$0xff]  ;;  %v342_v9 = vld [vmem:[%s1352_s13 + $0x128] sm:$0xff]  ;;  %v343_v11 = vld [vmem:[%s1352_s13 + $0x130] sm:$0xff] }
  0x79   : > { %v376_v16 = vadd.f32 %v375_v14, %v312_v13  ;;  %v344_v13 = vld [vmem:[%s1352_s13 + $0x138] sm:$0xff] }
  0x7b   : > { %v377_v18 = vadd.f32 %v376_v16, %v313_v15  ;;  %v345_v15 = vld [vmem:[%s1352_s13 + $0x140] sm:$0xff] }
  0x7d   : > { %v378_v20 = vadd.f32 %v377_v18, %v314_v17  ;;  %v346_v17 = vld [vmem:[%s1352_s13 + $0x148] sm:$0xff] }
  0x7f   : > { %v379_v22 = vadd.f32 %v378_v20, %v315_v19  ;;  %v347_v19 = vld [vmem:[%s1352_s13 + $0x150] sm:$0xff] }
  0x81   : > { %v380_v24 = vadd.f32 %v379_v22, %v316_v21  ;;  %v348_v21 = vld [vmem:[%s1352_s13 + $0x158] sm:$0xff] }
  0x83   : > { %v381_v26 = vadd.f32 %v380_v24, %v317_v23  ;;  %v349_v23 = vld [vmem:[%s1352_s13 + $0x160] sm:$0xff] }
  0x85   : > { %v382_v28 = vadd.f32 %v381_v26, %v318_v25  ;;  %v350_v25 = vld [vmem:[%s1352_s13 + $0x168] sm:$0xff] }
  0x87   : > { %v383_v30 = vadd.f32 %v382_v28, %v319_v27  ;;  %v351_v27 = vld [vmem:[%s1352_s13 + $0x170] sm:$0xff] }
  0x89   : > { %v384_v32 = vadd.f32 %v383_v30, %v320_v29  ;;  %v352_v29 = vld [vmem:[%s1352_s13 + $0x178] sm:$0xff] }
  0x8b   : > { %v385_v34 = vadd.f32 %v384_v32, %v321_v31  ;;  %v353_v31 = vld [vmem:[%s1352_s13 + $0x180] sm:$0xff] }
  0x8d   : > { %v386_v36 = vadd.f32 %v385_v34, %v322_v33  ;;  %v354_v33 = vld [vmem:[%s1352_s13 + $0x188] sm:$0xff] }
  0x8f   : > { %v387_v38 = vadd.f32 %v386_v36, %v323_v35  ;;  %v355_v35 = vld [vmem:[%s1352_s13 + $0x190] sm:$0xff] }
  0x91   : > { %v388_v40 = vadd.f32 %v387_v38, %v324_v37  ;;  %v356_v37 = vld [vmem:[%s1352_s13 + $0x198] sm:$0xff] }
  0x93   : > { %v389_v42 = vadd.f32 %v388_v40, %v325_v39  ;;  %v357_v39 = vld [vmem:[%s1352_s13 + $0x1a0] sm:$0xff] }
  0x95   : > { %v390_v44 = vadd.f32 %v389_v42, %v326_v41  ;;  %v358_v41 = vld [vmem:[%s1352_s13 + $0x1a8] sm:$0xff] }
  0x97   : > { %v391_v46 = vadd.f32 %v390_v44, %v327_v43  ;;  %v359_v43 = vld [vmem:[%s1352_s13 + $0x1b0] sm:$0xff] }
  0x99   : > { %v392_v48 = vadd.f32 %v391_v46, %v328_v45  ;;  %v360_v45 = vld [vmem:[%s1352_s13 + $0x1b8] sm:$0xff] }
  0x9b   : > { %v393_v50 = vadd.f32 %v392_v48, %v329_v47  ;;  %v361_v47 = vld [vmem:[%s1352_s13 + $0x1c0] sm:$0xff] }
  0x9d   : > { %v394_v52 = vadd.f32 %v393_v50, %v330_v49  ;;  %v362_v49 = vld [vmem:[%s1352_s13 + $0x1c8] sm:$0xff] }
  0x9f   : > { %v395_v54 = vadd.f32 %v394_v52, %v331_v51  ;;  %v363_v51 = vld [vmem:[%s1352_s13 + $0x1d0] sm:$0xff] }
  0xa1   : > { %v396_v56 = vadd.f32 %v395_v54, %v332_v53  ;;  %v364_v53 = vld [vmem:[%s1352_s13 + $0x1d8] sm:$0xff] }
  0xa3   : > { %v397_v58 = vadd.f32 %v396_v56, %v333_v55  ;;  %v365_v55 = vld [vmem:[%s1352_s13 + $0x1e0] sm:$0xff] }
  0xa5   : > { %v398_v60 = vadd.f32 %v397_v58, %v334_v57  ;;  %v366_v57 = vld [vmem:[%s1352_s13 + $0x1e8] sm:$0xff] }
  0xa7   : > { %v399_v62 = vadd.f32 %v398_v60, %v335_v59  ;;  %v367_v59 = vld [vmem:[%s1352_s13 + $0x1f0] sm:$0xff] }
  0xa9   : > { %v400_v0 = vadd.f32 %v399_v62, %v336_v61  ;;  %v368_v61 = vld [vmem:[%s1352_s13 + $0x1f8] sm:$0xff] }
  0xab   : > { %v401_v2 = vadd.f32 %v400_v0, %v337_v63 }
  0xad   : > { %v402_v4 = vadd.f32 %v401_v2, %v338_v1 }
  0xaf   : > { %v403_v6 = vadd.f32 %v402_v4, %v339_v3 }
  0xb1   : > { %v404_v8 = vadd.f32 %v403_v6, %v340_v5  ;;  %v369_v5 = vld [vmem:[#allocation2] sm:$0x1] }
  0xb3   : > { %v405_v10 = vadd.f32 %v404_v8, %v341_v7  ;;  %v448_v8 = vld [vmem:[%s1555_s2] sm:$0xff] (!%p745_p7) }
  0xb5   : > { %v406_v12 = vadd.f32 %v405_v10, %v342_v9  ;;  %v449_v9 = vld [vmem:[%s1555_s2 + $0x8] sm:$0xff] (!%p745_p7)  ;;  %v450_v10 = vld [vmem:[%s1555_s2 + $0x10] sm:$0xff] (!%p745_p7) }
  0xb7   : > { %v407_v14 = vadd.f32 %v406_v12, %v343_v11  ;;  %v1140_v11 = vmov (!%p745_p7), 0.0|0.0   ;;  %v813_v12 = vpack.c.bf16 (!%p745_p7), %v449_v9, %v448_v8 }
  0xb8   : > { %812 = vmatprep.subr.bf16.mxu0 (!%p745_p7), %v1140_v11  ;;  %836 = vmatprep.subr.bf16.mxu1 (!%p745_p7), %v1140_v11 }
  0xb9   : > { %v408_v16 = vadd.f32 %v407_v14, %v344_v13  ;;  %v451_v13 = vld [vmem:[%s1555_s2 + $0x18] sm:$0xff] (!%p745_p7)  ;;  %v1142_v14 = vmov (!%p745_p7), 0.0   ;;  %814 = vmatpush3.bf16.msra.mxu0 (!%p745_p7), %v813_v12 }
  0xba   : > { %802 = vmatprep.mubr.msk.f32.mxu0 (!%p745_p7), %vm1141_vm0, %v1142_v14  ;;  %809 = vmatprep.mubr.msk.f32.mxu1 (!%p745_p7), %vm1141_vm0, %v1142_v14 }
  0xbb   : > { %v409_v18 = vadd.f32 %v408_v16, %v345_v15  ;;  %v816_v15 = vpack.c.bf16 (!%p745_p7), %v451_v13, %v450_v10  ;;  %815 = vmatprep.subr.bf16.mxu0 (!%p745_p7), %v1140_v11  ;;  %v452_v16 = vld [vmem:[%s1555_s2 + $0x20] sm:$0xff] (!%p745_p7) }
  0xbd   : > { %v410_v20 = vadd.f32 %v409_v18, %v346_v17  ;;  %v453_v17 = vld [vmem:[%s1555_s2 + $0x28] sm:$0xff] (!%p745_p7)  ;;  %817 = vmatpush3.bf16.msra.mxu0 (!%p745_p7), %v816_v15 }
  0xbe   : > { %v819_v18 = vpack.c.bf16 (!%p745_p7), %v453_v17, %v452_v16  ;;  %818 = vmatprep.subr.bf16.mxu0 (!%p745_p7), %v1140_v11 }
  0xbf   : > { %v411_v22 = vadd.f32 %v410_v20, %v347_v19  ;;  %v454_v19 = vld [vmem:[%s1555_s2 + $0x30] sm:$0xff] (!%p745_p7)  ;;  %v455_v20 = vld [vmem:[%s1555_s2 + $0x38] sm:$0xff] (!%p745_p7) }
  0xc1   : > { %v412_v24 = vadd.f32 %v411_v22, %v348_v21  ;;  %820 = vmatpush3.bf16.msra.mxu0 (!%p745_p7), %v819_v18  ;;  %v822_v21 = vpack.c.bf16 (!%p745_p7), %v455_v20, %v454_v19  ;;  %v456_v22 = vld [vmem:[%s1555_s2 + $0x40] sm:$0xff] (!%p745_p7) }
  0xc2   : > { %821 = vmatprep.subr.bf16.mxu0 (!%p745_p7), %v1140_v11 }
  0xc3   : > { %v413_v26 = vadd.f32 %v412_v24, %v349_v23  ;;  %v457_v23 = vld [vmem:[%s1555_s2 + $0x48] sm:$0xff] (!%p745_p7) }
  0xc4   : > { %v825_v24 = vpack.c.bf16 (!%p745_p7), %v457_v23, %v456_v22 }
  0xc5   : > { %v414_v28 = vadd.f32 %v413_v26, %v350_v25  ;;  %823 = vmatpush3.bf16.msra.mxu0 (!%p745_p7), %v822_v21  ;;  %v458_v25 = vld [vmem:[%s1555_s2 + $0x50] sm:$0xff] (!%p745_p7)  ;;  %v459_v26 = vld [vmem:[%s1555_s2 + $0x58] sm:$0xff] (!%p745_p7) }
  0xc6   : > { %824 = vmatprep.subr.bf16.mxu0 (!%p745_p7), %v1140_v11 }
  0xc7   : > { %v415_v30 = vadd.f32 %v414_v28, %v351_v27  ;;  %v828_v27 = vpack.c.bf16 (!%p745_p7), %v459_v26, %v458_v25  ;;  %v460_v28 = vld [vmem:[%s1555_s2 + $0x60] sm:$0xff] (!%p745_p7) }
  0xc9   : > { %v416_v32 = vadd.f32 %v415_v30, %v352_v29  ;;  %826 = vmatpush3.bf16.msra.mxu0 (!%p745_p7), %v825_v24  ;;  %v461_v29 = vld [vmem:[%s1555_s2 + $0x68] sm:$0xff] (!%p745_p7) }
  0xca   : > { %827 = vmatprep.subr.bf16.mxu0 (!%p745_p7), %v1140_v11  ;;  %v831_v30 = vpack.c.bf16 (!%p745_p7), %v461_v29, %v460_v28 }
  0xcb   : > { %v417_v34 = vadd.f32 %v416_v32, %v353_v31  ;;  %v462_v31 = vld [vmem:[%s1555_s2 + $0x70] sm:$0xff] (!%p745_p7)  ;;  %v463_v32 = vld [vmem:[%s1555_s2 + $0x78] sm:$0xff] (!%p745_p7) }
  0xcd   : > { %v418_v36 = vadd.f32 %v417_v34, %v354_v33  ;;  %829 = vmatpush3.bf16.msra.mxu0 (!%p745_p7), %v828_v27  ;;  %v834_v33 = vpack.c.bf16 (!%p745_p7), %v463_v32, %v462_v31 }
  0xce   : > { %830 = vmatprep.subr.bf16.mxu0 (!%p745_p7), %v1140_v11 }
  0xcf   : > { %v419_v38 = vadd.f32 %v418_v36, %v355_v35  ;;  %v539_v36 = vld [vmem:[%s1557_s4] sm:$0xff] (!%p745_p7) }
  0xd1   : > { %v420_v40 = vadd.f32 %v419_v38, %v356_v37  ;;  %832 = vmatpush3.bf16.msra.mxu0 (!%p745_p7), %v831_v30  ;;  %v540_v37 = vld [vmem:[%s1557_s4 + $0x8] sm:$0xff] (!%p745_p7) }
  0xd2   : > { %833 = vmatprep.subr.bf16.mxu0 (!%p745_p7), %v1140_v11  ;;  %v837_v38 = vpack.c.bf16 (!%p745_p7), %v540_v37, %v539_v36 }
  0xd3   : > { %v421_v42 = vadd.f32 %v420_v40, %v357_v39  ;;  %v464_v39 = vld [vmem:[%s1556_s3] sm:$0x1] (!%p745_p7) }
  0xd4   : > { %838 = vmatpush3.bf16.msra.mxu1 (!%p745_p7), %v837_v38 }
  0xd5   : > { %v422_v44 = vadd.f32 %v421_v42, %v358_v41  ;;  %835 = vmatpush3.bf16.msra.mxu0 (!%p745_p7), %v834_v33  ;;  %v536_v41 = vstv (!%p745_p7), %s445_s19 }
  0xd7   : > { %v423_v46 = vadd.f32 %v422_v44, %v359_v43 }
  0xd9   : > { %v424_v48 = vadd.f32 %v423_v46, %v360_v45  ;;  %v541_v46 = vld [vmem:[%s1558_s5] sm:$0x1] (!%p745_p7) }
  0xdb   : > { %v425_v50 = vadd.f32 %v424_v48, %v361_v47 }
  0xdd   : > { %v426_v52 = vadd.f32 %v425_v50, %v362_v49 }
  0xdf   : > { %v427_v54 = vadd.f32 %v426_v52, %v363_v51 }
  0xe1   : > { %v428_v56 = vadd.f32 %v427_v54, %v364_v53 }
  0xe3   : > { %v429_v58 = vadd.f32 %v428_v56, %v365_v55 }
  0xe5   : > { %v430_v60 = vadd.f32 %v429_v58, %v366_v57 }
  0xe7   : > { %v431_v62 = vadd.f32 %v430_v60, %v367_v59 }
  0xe9   : > { %v432_v63 = vadd.f32 %v431_v62, %v368_v61 }
  0xeb   : > { %v433_v0 = vrot.slane %v432_v63, 4 }
  0xed   : > { %v434_v1 = vadd.f32 %v433_v0, %v432_v63 }
  0xef   : > { %v435_v2 = vrot.slane %v434_v1, 2 }
  0xf1   : > { %v436_v3 = vadd.f32 %v435_v2, %v434_v1 }
  0xf3   : > { %v437_v4 = vrot.slane %v436_v3, 1  ;;  %444 = sbr.rel (%p745_p7) target bundleno = 724 (0x2d4), region = 60 }
  0xf5   : > { %v438_v6 = vadd.f32 %v437_v4, %v436_v3 }
  0xf7   : > { %v439_v7 = vadd.f32 %v438_v6, %v369_v5 }
  0xf9   : > { %440 = vst [vmem:[#allocation2] sm:$0x1] %v439_v7 }
 0x100   : > { %v446_v34 = vld [vmem:[#allocation2] sm:$0x1] }
 0x101   : > { %v447_v35 = vmul.f32 0.0009765625, %v446_v34 }
 0x103   : > { %803 = vmatmul.mubr.f32.vlgmr.msra.gmra.mrb[0].mxu0 %v447_v35 }
 0x1d6   : > { %v531_v40 = vpop.f32.mrb[0].mxu0 }
 0x1d7   : > { %v532_v42 = vadd.f32 %v531_v40, %v464_v39  ;;  %v804_v43 = vpop.f32.mrb[1].mxu0 }
 0x1d9   : > { %vm535_vm1 = vcmp.ge.f32.partialorder %v532_v42, 0.0  ;;  %v537_v44 = vmul.f32 %v536_v41, %v532_v42 }
 0x1db   : > { %v538_v45 = vsel %vm535_vm1, %v532_v42, %v537_v44 }
 0x1dc   : > { %810 = vmatmul.mubr.msk.f32.vlgmr.msra.gmra.mrb[0].mxu1 %vm542_vm2, %v538_v45 }
 0x2af   : > { %v612_v47 = vpop.f32.mrb[0].mxu1 }
 0x2b0   : > { %v613_v48 = vadd.f32 %v612_v47, %v541_v46  ;;  %v811_v49 = vpop.f32.mrb[1].mxu1 }
 0x2b2   : > { %v616_v50 = vand.u32 2147483647, %v613_v48  ;;  %vm620_vm3 = vcmp.ge.f32.partialorder %v613_v48, 0.0 }
 0x2b4   : > { %v617_v51 = vsub.f32 0.0, %v616_v50 }
 0x2b6   : > { %v618_v52 = vmul.f32 1.442695, %v617_v51 }
 0x2b8   : > { %958 = vpow2.f32 %v618_v52 }
 0x2c2   : > { %v959_v53 = vpop.eup %958 }
 0x2c3   : > { %v621_v54 = vadd.f32 1.0, %v959_v53 }
 0x2c5   : > { %960 = vrcp.f32 %v621_v54 }
 0x2cf   : > { %v961_v55 = vpop.eup %960 }
 0x2d0   : > { %v624_v56 = vmul.f32 %v961_v55, %v959_v53 }
 0x2d2   : > { %v625_v57 = vsel %vm620_vm3, %v961_v55, %v624_v56 }
 0x2d3   : > { %626 = vst [vmem:[%s1361_s20] sm:$0x1] %v625_v57 }
 0x2d4 PF: > { %s1594_s0 = sld [smem:[#allocation15_spill]]  ;;  %s747_s8 = sshll.u32 %s1121_s28, 4 }
 0x2d5   : > { %s1595_s7 = sld [smem:[#allocation20_spill]]  ;;  %s640_s11 = sshll.u32 %s1361_s20, 4  ;;  %s641_s11 = int_to_ptr.vmem [resolvable:$true] %s640_s11 }
 0x2d6   : > { %s628_s14 = scalar_lea.sflag [#allocation5], %s297_s29  ;;  %s1007_s24 = scalar_lea.vmem %s641_s11, 16 }
 0x2d7   : > { %p1008_p13 = scmp.ne.s32.totalorder %s641_s11, %s1007_s24  ;;  %s1143_s17 = smov [#allocation8]  }
 0x2d8   : > { %s1011_s19 = sshll.u32 %s1143_s17, 4  ;;  %s1012_s19 = int_to_ptr.vmem [resolvable:$false] %s1011_s19 }
 0x2d9   : > { %s1013_s18 = scalar_lea.vmem %s1012_s19, 32  ;;  %p1014_p12 = scmp.lt.s32.totalorder %s641_s11, %s1012_s19 }
 0x2da   : > { %p1597_p4 = scmp.ne.s32.totalorder %s1594_s0, 0  ;;  %p1015_p0 = scmp.lt.s32.totalorder %s1013_s18, %s1007_s24 }
 0x2db   : > { %s1596_s15 = smov %s1595_s7  ;;  %s1494_s13 = scalar_lea.hbm %s1595_s7, %s747_s8 }
 0x2dc   : > { %p1009_p6 = pnand %p1008_p13, %p1597_p4  ;;  %p1016_p2 = por %p1015_p0, %p1014_p12 }
 0x2de   : > { %p1010_p10 = pneg %p1009_p6 }
 0x2e0   : > { %p1017_p8 = pnand %p1016_p2, %p1010_p10 }
 0x2e2   : > { %1020 = shalt.err (!%p1017_p8)
}
 0x2e3   : > { %s1021_s28 = scalar_lea.hbm %s1494_s13, 16  ;;  %s1025_s9 = scalar_lea.hbm %s1596_s15, 32 }
 0x2e4   : > { %p1022_p9 = scmp.ne.s32.totalorder %s1494_s13, %s1021_s28  ;;  %p1026_p5 = scmp.lt.u32.totalorder %s1494_s13, %s1596_s15 }
 0x2e5   : > { %p1027_p3 = scmp.lt.u32.totalorder %s1025_s9, %s1021_s28  ;;  %p1029_p13 = scmp.lt.u32.totalorder %s1021_s28, %s1494_s13 }
 0x2e6   : > { %p1023_p11 = pnand %p1022_p9, %p1597_p4 }
 0x2e7   : > { %p1028_p7 = por %p1027_p3, %p1026_p5 }
 0x2e8   : > { %p1024_p1 = pneg %p1023_p11 }
 0x2e9   : > { %p1030_p6 = por %p1029_p13, %p1028_p7 }
 0x2eb   : > { %p1031_p10 = pnand %p1030_p6, %p1024_p1 }
 0x2ed   : > { %1034 = shalt.err (!%p1031_p10)
}
 0x2ee   : > { %845 = dma.vmem_to_hbm [thread:$0]  (%p1597_p4), %s641_s11, 16, %s1494_s13, %s628_s14  }
 0x2ef PF: > { %s1598_s8 = sld [smem:[#allocation14_spill]]  ;;  %s1599_s6 = sld [smem:[#allocation12_spill]] }
 0x2f0   : > { %s1600_s21 = sld [smem:[#allocation16_spill]] }
 0x2f5   : > { %p862_p12 = scmp.ge.s32.totalorder %s1598_s8, 2  ;;  %s652_s7 = sand.u32 1, %s1599_s6  }
 0x2f6   : > { %p1601_p0 = scmp.ne.s32.totalorder %s1600_s21, 0  ;;  %s653_s24 = scalar_lea.sflag [#allocation5], %s652_s7 }
 0x2f8   : > { %p856_p2 = pnand %p862_p12, %p1601_p0 }
 0x2fa   : > { %1088 = dma.done.wait (!%p856_p2), %s653_s24, 16  }
 0x2fb   : > { %1090 = vsyncadd (!%p856_p2), %s653_s24, 4294967280  ;;  %s23_s7 = sadd.s32 1, %s1598_s8   ;;  %s1602_s27 = sld [smem:[#allocation13_spill]] }
 0x2fc   : > { %p20_p8 = scmp.ge.s32.totalorder %s23_s7, 6   ;;  %s1603_s29 = sld [smem:[#allocation17_spill]] }
 0x2fd   : > { %s1604_s0 = sld [smem:[#allocation18_spill]]  ;;  %s1605_s21 = smov %s1097_s22 }
 0x2fe   : > { %s1606_s22 = smov %s1101_s23  ;;  %s1607_s23 = smov %s1310_s16 }
 0x2ff   : > { %s1608_s24 = smov %s1109_s25  ;;  %s1609_s25 = smov %s1113_s26 }
 0x300   : > { %s1610_s26 = smov %s1315_s12  ;;  %s1611_s28 = smov %s1129_s30 }
 0x301   :  { %22 = sbr.rel (!%p20_p8) target bundleno = 13 (0xd), region = 102 }
 0x303   : > { %s1612_s30 = smov %s1604_s0 }
 0x308   :  { %657 = vsyncpa [#allocation4], 1 }
 0x309   :  { %659 = vsyncpa [#allocation4 + $0x1], 1 }
 0x30a   :  { %660 = vsyncpa [#allocation5], 1 }
 0x30b   :  { %662 = vsyncpa [#allocation5 + $0x1], 1 }
 0x30c   :  { %663 = vsyncpa [#allocation6], 1 }
 0x30d   :  { %665 = vsyncpa [#allocation6 + $0x1], 1 }

</bundles_post_ra>
